<compile_context>
chip_gen: v6e
topology: v6e:2x2x1
jax: 0.10.0
libtpu: 0.0.40
codegen_flags: <defaults>
</compile_context>

<pallas_src>
import math
import jax
import jax.numpy as jnp
from jax.experimental import pallas as pl
from jax.experimental.pallas import tpu as pltpu


# ----------------------------------------------------------------------------- pe construction
def make_pe(d_model: int, height: int, width: int, dtype=jnp.float32) -> jnp.ndarray:
    """Replicates PositionalEncoding2D.__init__ buffer `pe` (without the batch dim)."""
    if d_model % 4 != 0:
        raise ValueError("d_model must be divisible by 4 for 2D positional encoding")
    y_pos = jnp.arange(height, dtype=jnp.float32)[:, None]         # (H, 1) -> (H, W)
    x_pos = jnp.arange(width, dtype=jnp.float32)[None, :]          # (1, W) -> (H, W)
    k = jnp.arange(0, d_model // 2, 2, dtype=jnp.float32)          # (d_model // 4,)
    div_term = jnp.exp(k * -(math.log(10000.0) / (d_model // 2)))  # (d_model // 4,)

    y_term = y_pos[None, :, :] * div_term[:, None, None]           # (d_model//4, H, W)
    x_term = x_pos[None, :, :] * div_term[:, None, None]           # (d_model//4, H, W)

    pe = jnp.zeros((d_model, height, width), dtype=dtype)
    pe = pe.at[0::4, :, :].set(jnp.sin(y_term).astype(dtype))
    pe = pe.at[1::4, :, :].set(jnp.cos(y_term).astype(dtype))
    pe = pe.at[2::4, :, :].set(jnp.sin(x_term).astype(dtype))
    pe = pe.at[3::4, :, :].set(jnp.cos(x_term).astype(dtype))
    return pe


def _pad_to_multiple(n: int, m: int) -> int:
    return ((n + m - 1) // m) * m


def prepare_pe(pe: jnp.ndarray, C: int, H: int, W: int, dtype) -> jnp.ndarray:
    """One-time init: slice to (C, H, W) (as the PyTorch forward does), cast to the activation
    dtype, flatten to the lane-dense (C, H*W) layout and pad the lane axis to a multiple of 128.
    NOTE: casting pe to bf16 here differs slightly from PyTorch (which adds the f32 buffer)."""
    HW = H * W
    HW_pad = _pad_to_multiple(HW, 128)
    pe_flat = pe[:C, :H, :W].astype(dtype).reshape(C, HW)
    if HW_pad != HW:
        pe_flat = jnp.pad(pe_flat, ((0, 0), (0, HW_pad - HW)))
    return pe_flat


# ----------------------------------------------------------------------------- tiling selection
def _sublane_multiple(itemsize: int) -> int:
    # Native sublane pack: 8 rows for 32-bit, 16 for 16-bit, 32 for 8-bit dtypes.
    return {4: 8, 2: 16, 1: 32}.get(itemsize, 8)


def _divisors_desc(n: int, multiple_of: int = 1):
    return [d for d in range(n, 0, -1) if n % d == 0 and d % multiple_of == 0]


def _vmem_budget() -> tuple[int, int]:
    """Returns (vmem_limit_bytes for the compiler, tile budget in bytes for the pipelined
    footprint). Derived from the device so v7x's 64 MiB VMEM is never oversubscribed while
    v5e/v6e's 128 MiB is actually used."""
    try:
        cap = pltpu.get_tpu_info().vmem_capacity_bytes
    except Exception:
        cap = 64 * 1024 * 1024  # conservative fallback (v7x-sized)
    limit = min(int(cap * 0.75), 96 * 1024 * 1024)   # 96 MiB on v5e/v6e, 48 MiB on v7x
    budget = int(limit * 0.75)                        # headroom for compiler scratch
    return limit, budget


def _choose_tiles(B: int, C: int, HW: int, itemsize: int, budget_bytes: int):
    """Pick (bb, tc, thw): batch-fold, channel tile and lane tile.
    Footprint model: x and out double-buffered (4*bb) + pe double-buffered (2)."""
    step = _sublane_multiple(itemsize)
    tc_cands = _divisors_desc(C, step) or _divisors_desc(C, 8) or [C]
    thw_cands = _divisors_desc(HW, 128) or [HW]

    def footprint(bb, tc, thw):
        return (4 * bb + 2) * tc * thw * itemsize

    # 1) Full-HW tile, largest channel tile that fits with bb = 1.
    thw = HW
    tc = next((t for t in tc_cands if footprint(1, t, thw) <= budget_bytes), None)
    if tc is None:
        # 2) Even the smallest channel tile is too big: tile the lane axis as well
        #    (graceful fallback instead of blowing the scoped VMEM limit).
        tc = tc_cands[-1]
        thw = next((h for h in thw_cands if footprint(1, tc, h) <= budget_bytes),
                   thw_cands[-1])
    # 3) Fold batch elements into the block with any leftover budget (bigger DMAs,
    #    fewer grid steps for small C*HW).
    bb = next((b for b in _divisors_desc(B) if footprint(b, tc, thw) <= budget_bytes), 1)
    return bb, tc, thw


# ----------------------------------------------------------------------------- kernel + wrapper
def _add_pe_kernel(x_ref, pe_ref, o_ref):
    # x_ref / o_ref: (bb, tc, thw); pe_ref: (tc, thw). Broadcast over the folded batch dim.
    o_ref[...] = x_ref[...] + pe_ref[...][None]


def positional_encoding_2d(x: jnp.ndarray, pe_flat: jnp.ndarray) -> jnp.ndarray:
    """Forward pass: x + pe broadcast over batch.  x: (B, C, H, W); pe_flat: (C, HW_pad)."""
    B, C, H, W = x.shape
    HW = H * W
    HW_pad = _pad_to_multiple(HW, 128)
    assert pe_flat.shape == (C, HW_pad), (
        f"pe_flat must be {(C, HW_pad)} (from prepare_pe), got {pe_flat.shape}")
    assert pe_flat.dtype == x.dtype, "call prepare_pe with the activation dtype"

    itemsize = jnp.dtype(x.dtype).itemsize
    vmem_limit, budget = _vmem_budget()
    bb, tc, thw = _choose_tiles(B, C, HW_pad, itemsize, budget)
    num_c, num_hw, num_b = C // tc, HW_pad // thw, B // bb

    # Lane-dense view; pad the lane axis to a multiple of 128 so every store is full-width.
    x_flat = x.reshape(B, C, HW)
    if HW_pad != HW:
        x_flat = jnp.pad(x_flat, ((0, 0), (0, 0), (0, HW_pad - HW)))

    cost = pl.CostEstimate(
        flops=B * C * HW_pad,
        transcendentals=0,
        bytes_accessed=(2 * B * C * HW_pad + C * HW_pad) * itemsize,
    )

    out_flat = pl.pallas_call(
        _add_pe_kernel,
        out_shape=jax.ShapeDtypeStruct((B, C, HW_pad), x.dtype),
        grid_spec=pltpu.PrefetchScalarGridSpec(
            num_scalar_prefetch=0,
            # Batch is the innermost grid axis so the pe tile (indexed only by (c, h))
            # stays resident across the whole batch -> pe HBM traffic is O(C*HW).
            grid=(num_c, num_hw, num_b),
            in_specs=[
                pl.BlockSpec((bb, tc, thw), lambda c, h, b: (b, c, h)),
                pl.BlockSpec((tc, thw), lambda c, h, b: (c, h)),
            ],
            out_specs=pl.BlockSpec((bb, tc, thw), lambda c, h, b: (b, c, h)),
        ),
        compiler_params=pltpu.CompilerParams(
            # All axes independent -> shardable across v7x's two TensorCores.
            dimension_semantics=("parallel", "parallel", "parallel"),
            vmem_limit_bytes=vmem_limit,
        ),
        cost_estimate=cost,
        # NOTE: input_output_aliases={0: 0} would do the add in place on x (frees the extra
        # output allocation); left off so the caller's x stays valid for reference checks.
    )(x_flat, pe_flat)

    if HW_pad != HW:
        out_flat = out_flat[:, :, :HW]
    return out_flat.reshape(B, C, H, W)


if __name__ == "__main__":
    # Module hyperparameters (d_model must be divisible by 4).
    d_model, height, width = 8, 16, 16
    batch = 2

    # The pe buffer is fully determined by (d_model, height, width) — "init".
    pe = make_pe(d_model, height, width, dtype=jnp.float32)

    # Deterministic example input.
    key = jax.random.PRNGKey(0)
    x = jax.random.normal(key, (batch, d_model, height, width), dtype=jnp.float32)

    # One-time prep: slice/cast/flatten/pad pe into the lane-dense layout the kernel uses.
    pe_flat = prepare_pe(pe, d_model, height, width, x.dtype)

    out = positional_encoding_2d(x, pe_flat)
    out = jax.block_until_ready(out)

    # Sanity check against the pure-JAX reference of the forward semantics.
    ref = x + pe[None, :, :, :]
    assert out.shape == x.shape
    assert jnp.allclose(out, ref, atol=1e-6), "mismatch vs reference"

    print("KERNEL_OK")
</pallas_src>

<mosaic_0001>
module attributes {stable_mosaic.version = 11 : i64} {
  func.func @_add_pe_kernel(%arg0: i32, %arg1: i32, %arg2: i32, %arg3: memref<2x8x256xf32, #tpu.memory_space<vmem>>, %arg4: memref<8x256xf32, #tpu.memory_space<vmem>>, %arg5: memref<2x8x256xf32, #tpu.memory_space<vmem>>) attributes {dimension_semantics = [#tpu.dimension_semantics<parallel>, #tpu.dimension_semantics<parallel>, #tpu.dimension_semantics<parallel>], iteration_bounds = array<i64: 1, 1, 1>, scalar_prefetch = 0 : i64, scratch_operands = 0 : i64, tpu.core_type = #tpu.core_type<tc>, window_params = [{transform_indices = @transform_0, window_bounds = array<i64: 2, 8, 256>}, {transform_indices = @transform_1, window_bounds = array<i64: 8, 256>}, {transform_indices = @transform_2, window_bounds = array<i64: 2, 8, 256>}]} {
    %c0 = arith.constant 0 : index
    %c0_0 = arith.constant 0 : index
    %c0_1 = arith.constant 0 : index
    %0 = vector.load %arg3[%c0, %c0_0, %c0_1] : memref<2x8x256xf32, #tpu.memory_space<vmem>>, vector<2x8x256xf32>
    %c0_2 = arith.constant 0 : index
    %c0_3 = arith.constant 0 : index
    %1 = vector.load %arg4[%c0_2, %c0_3] : memref<8x256xf32, #tpu.memory_space<vmem>>, vector<8x256xf32>
    %2 = vector.shape_cast %1 : vector<8x256xf32> to vector<1x8x256xf32>
    %3 = vector.broadcast %2 : vector<1x8x256xf32> to vector<2x8x256xf32>
    %4 = arith.addf %0, %3 : vector<2x8x256xf32>
    %c0_4 = arith.constant 0 : index
    %c0_5 = arith.constant 0 : index
    %c0_6 = arith.constant 0 : index
    %5 = vector.load %arg5[%c0_4, %c0_5, %c0_6] : memref<2x8x256xf32, #tpu.memory_space<vmem>>, vector<2x8x256xf32>
    tpu.vector_store %arg5[%c0_4, %c0_5, %c0_6], %4 {strides = array<i32>} : memref<2x8x256xf32, #tpu.memory_space<vmem>>, vector<2x8x256xf32>,
    return
  }
  func.func @transform_0(%arg0: i32, %arg1: i32, %arg2: i32) -> (i32, i32, i32) {
    %c0_i32 = arith.constant 0 : i32
    return %arg2, %arg0, %arg1 : i32, i32, i32
  }
  func.func @transform_1(%arg0: i32, %arg1: i32, %arg2: i32) -> (i32, i32) {
    %c0_i32 = arith.constant 0 : i32
    return %arg0, %arg1 : i32, i32
  }
  func.func @transform_2(%arg0: i32, %arg1: i32, %arg2: i32) -> (i32, i32, i32) {
    %c0_i32 = arith.constant 0 : i32
    return %arg2, %arg0, %arg1 : i32, i32, i32
  }
}

</mosaic_0001>

<bundles_post_ra>
// kernel: tpu_custom_call.1
= control target key start
LH: loop header
LB: loop body
LE: loop exit
PB: predicated region body
PF: predicated region fallthrough
CT: control target
= control target key end

     0   :  { %7 = vsyncpa [#allocation3], 0  ;;  %s176_s0 = inlined_call_operand.hbm [shape: f32[2,8,256], index: 0, kind: input, shape index: {}]   ;;  %s177_s1 = inlined_call_operand.hbm [shape: f32[8,256], index: 1, kind: input, shape index: {}]   ;;  %s178_s2 = inlined_call_operand.hbm [shape: f32[2,8,256], index: 2, kind: output, shape index: {}]  }
   0x1   :  { %8 = vsyncpa [#allocation6], 0 }
   0x2   :  { %9 = vsyncpa [#allocation4], 0  ;;  %s141_s9 = smov [#allocation2]  }
   0x3   :  { %s15_s10 = sshll.u32 %s141_s9, 4  ;;  %s16_s10 = int_to_ptr.vmem [resolvable:$true] %s15_s10 }
   0x4   :  { %s83_s11 = scalar_lea.vmem %s16_s10, 512  ;;  %p88_p1 = scmp.lt.s32.totalorder %s16_s10, %s16_s10 }
   0x5   :  { %p84_p0 = scmp.ne.s32.totalorder %s16_s10, %s83_s11  ;;  %p89_p2 = scmp.lt.s32.totalorder %s83_s11, %s83_s11 }
   0x7   :  { %p90_p3 = por %p89_p2, %p88_p1 }
   0x9   :  { %p91_p4 = pnand %p90_p3, %p84_p0 }
   0xb   :  { %94 = shalt.err (!%p91_p4)
}
   0xc   :  { %s142_s12 = smov 256   ;;  %s143_s13 = smov 16  }
   0xd   :  { %21 = dma.hbm_to_vmem [thread:$0]  %s176_s0, 512, %s16_s10, [#allocation3], %s142_s12, %s142_s12, %s143_s13  }
   0xe   :  { %s144_s16 = smov [#allocation5]  }
   0xf   :  { %s28_s17 = sshll.u32 %s144_s16, 4  ;;  %s29_s17 = int_to_ptr.vmem [resolvable:$true] %s28_s17 }
  0x10   :  { %s103_s18 = scalar_lea.vmem %s29_s17, 256  ;;  %p108_p6 = scmp.lt.s32.totalorder %s29_s17, %s29_s17 }
  0x11   :  { %p104_p5 = scmp.ne.s32.totalorder %s29_s17, %s103_s18  ;;  %p109_p7 = scmp.lt.s32.totalorder %s103_s18, %s103_s18 }
  0x13   :  { %p110_p8 = por %p109_p7, %p108_p6 }
  0x15   :  { %p111_p9 = pnand %p110_p8, %p104_p5 }
  0x17   :  { %114 = shalt.err (!%p111_p9)
}
  0x18   :  { %31 = dma.hbm_to_vmem [thread:$0]  %s177_s1, 256, %s29_s17, [#allocation6]  }
  0x19   :  { %135 = dma.done.wait [#allocation3], 512  }
  0x1a   :  { %136 = vsyncadd [#allocation3], 4294966784 }
  0x1b   :  { %137 = dma.done.wait [#allocation6], 256  }
  0x1c   :  { %138 = vsyncadd [#allocation6], 4294967040  ;;  %s145_s21 = smov [#allocation7]   ;;  %v38_v0 = vld [vmem:[#allocation2] sm:$0xff]  ;;  %v39_v2 = vld [vmem:[#allocation2 + $0x8] sm:$0xff] }
  0x1d   :  { %s57_s0 = sshll.u32 %s145_s21, 4  ;;  %v42_v1 = vld [vmem:[#allocation5] sm:$0xff]  ;;  %v43_v4 = vld [vmem:[#allocation5 + $0x8] sm:$0xff]  ;;  %v40_v5 = vld [vmem:[#allocation2 + $0x10] sm:$0xff]  ;;  %s58_s0 = int_to_ptr.vmem [resolvable:$true] %s57_s0 }
  0x1e   :  { %v44_v3 = vadd.f32 %v42_v1, %v38_v0  ;;  %v41_v6 = vld [vmem:[#allocation2 + $0x18] sm:$0xff]  ;;  %v45_v7 = vadd.f32 %v43_v4, %v39_v2  ;;  %v46_v8 = vadd.f32 %v42_v1, %v40_v5  ;;  %s115_s1 = scalar_lea.vmem %s58_s0, 512  ;;  %p120_p11 = scmp.lt.s32.totalorder %s58_s0, %s58_s0 }
  0x1f   :  { %v47_v9 = vadd.f32 %v43_v4, %v41_v6  ;;  %p116_p10 = scmp.ne.s32.totalorder %s58_s0, %s115_s1  ;;  %p121_p12 = scmp.lt.s32.totalorder %s115_s1, %s115_s1 }
  0x20   :  { %48 = vst [vmem:[#allocation7] sm:$0xff] %v44_v3  ;;  %49 = vst [vmem:[#allocation7 + $0x8] sm:$0xff] %v45_v7 }
  0x21   :  { %50 = vst [vmem:[#allocation7 + $0x10] sm:$0xff] %v46_v8  ;;  %51 = vst [vmem:[#allocation7 + $0x18] sm:$0xff] %v47_v9  ;;  %p122_p13 = por %p121_p12, %p120_p11 }
  0x23   :  { %p123_p0 = pnand %p122_p13, %p116_p10 }
  0x25   :  { %126 = shalt.err (!%p123_p0)
}
  0x26   :  { %63 = dma.vmem_to_hbm [thread:$0]  %s58_s0, 512, %s178_s2, [#allocation4], %s142_s12, %s142_s12, %s143_s13  }
  0x27   :  { %139 = dma.done.wait [#allocation4], 512  }
  0x28   :  { %140 = vsyncadd [#allocation4], 4294966784 }
  0x29   :  { %67 = vsyncpa [#allocation3], 1 }
  0x2a   :  { %68 = vsyncpa [#allocation6], 1 }
  0x2b   :  { %69 = vsyncpa [#allocation4], 1 }

</bundles_post_ra>
